<compile_context>
chip_gen: v6e
topology: v6e:2x2x1
jax: 0.10.0
libtpu: 0.0.40
codegen_flags: <defaults>
</compile_context>

<pallas_src>
import functools

import jax
import jax.numpy as jnp
from jax.experimental import pallas as pl
from jax.experimental.pallas import tpu as pltpu


# ----------------------------------------------------------------------------
# helpers
# ----------------------------------------------------------------------------
def _round_up(n, m):
    return ((n + m - 1) // m) * m


def _chip_info():
    """One-time hardware query. v7x is the only generation with 64 MiB/TC VMEM
    (and 2 TensorCores/chip); v5e/v6e have 128 MiB and a single TensorCore."""
    vmem = 128 << 20
    try:
        info = pltpu.get_tpu_info()
        vmem = int(getattr(info, "vmem_capacity_bytes", vmem))
    except Exception:  # pragma: no cover - conservative default off-TPU
        pass
    num_tc = 2 if vmem <= (64 << 20) else 1
    return {"vmem_bytes": vmem, "num_tc": num_tc}


_BUFFERED_OK = None


def _buffered_supported():
    """Probe pl.Buffered(1) (single-buffered resident weights) ONCE with a tiny
    kernel compile. Result is cached; the hot path never retries/falls back."""
    global _BUFFERED_OK
    if _BUFFERED_OK is None:
        try:
            def k(x_ref, o_ref):
                o_ref[...] = x_ref[...]

            spec = pl.BlockSpec((8, 128), lambda i: (0, 0),
                                pipeline_mode=pl.Buffered(1))
            out = pl.pallas_call(
                k,
                out_shape=jax.ShapeDtypeStruct((8, 128), jnp.float32),
                grid=(1,),
                in_specs=[spec],
                out_specs=pl.BlockSpec((8, 128), lambda i: (0, 0)),
            )(jnp.zeros((8, 128), jnp.float32))
            jax.block_until_ready(out)
            _BUFFERED_OK = True
        except Exception:
            _BUFFERED_OK = False
    return _BUFFERED_OK


# ----------------------------------------------------------------------------
# Pallas kernel: two accumulated dots -> tanh -> dot -> sigmoid -> mul
# ----------------------------------------------------------------------------
def _reordering_kernel(x_ref, li_ref, pos_ref,
                       w1t_ref, w2t_ref, b12_ref, vt_ref, bv_ref,
                       o_ref):
    # Stage 1: two K=Dp MXU contractions accumulated in f32 (no lane concat temp).
    h = jnp.dot(li_ref[...], w1t_ref[...], preferred_element_type=jnp.float32)
    h = h + jnp.dot(x_ref[...], w2t_ref[...], preferred_element_type=jnp.float32)
    t = jnp.tanh(h + b12_ref[...])                                   # EUP
    # Stage 2: gate and multiply with the position embedding.
    logits = jnp.dot(t.astype(vt_ref.dtype), vt_ref[...],
                     preferred_element_type=jnp.float32) + bv_ref[...]
    gate = jax.nn.sigmoid(logits)
    o_ref[...] = (gate * pos_ref[...].astype(jnp.float32)).astype(o_ref.dtype)


@functools.partial(jax.jit,
                   static_argnames=("tm", "Mp", "Dp", "single_buf", "vmem_cap"))
def _ls_reorder_forward(x, layer_input, position_embedding,
                        w1t, w2t, b12, vt, bv,
                        *, tm, Mp, Dp, single_buf, vmem_cap):
    """Whole pre + pallas_call + post path under one jit so casts/pads/slices fuse."""
    S, B, D = x.shape
    M = S * B
    matmul_dtype = w1t.dtype
    out_dtype = x.dtype
    needs_pad = (Mp != M) or (Dp != D)

    def prep(a, dt):
        a2 = a.reshape(M, D)
        if a2.dtype != dt:
            a2 = a2.astype(dt)
        if needs_pad:
            a2 = jnp.pad(a2, ((0, Mp - M), (0, Dp - D)))
        return a2

    x2 = prep(x, matmul_dtype)
    li2 = prep(layer_input, matmul_dtype)
    pos2 = prep(position_embedding, position_embedding.dtype)

    in_isize = matmul_dtype.itemsize
    pos_isize = position_embedding.dtype.itemsize
    out_isize = jnp.dtype(out_dtype).itemsize
    w_isize = in_isize
    w_bufs = 1 if single_buf else 2

    # VMEM budget: double-buffered I/O row tiles + f32 intermediates + resident weights.
    est = (tm * Dp * (2 * in_isize + pos_isize + out_isize) * 2
           + 5 * tm * Dp * 4
           + 3 * Dp * Dp * w_isize * w_bufs + 2 * Dp * 4 * w_bufs)
    vmem_limit = max(16 << 20,
                     min(int(1.5 * est) + (2 << 20), int(vmem_cap) * 3 // 4))

    steps = Mp // tm
    row_spec = pl.BlockSpec((tm, Dp), lambda i: (i, 0))
    wkw = dict(pipeline_mode=pl.Buffered(1)) if single_buf else {}
    w_spec = pl.BlockSpec((Dp, Dp), lambda i: (0, 0), **wkw)
    bias_spec = pl.BlockSpec((1, Dp), lambda i: (0, 0), **wkw)

    cost = pl.CostEstimate(
        flops=6 * Mp * Dp * Dp,
        transcendentals=2 * Mp * Dp,
        bytes_accessed=Mp * Dp * (2 * in_isize + pos_isize + out_isize)
        + 3 * Dp * Dp * w_isize)

    out2 = pl.pallas_call(
        _reordering_kernel,
        out_shape=jax.ShapeDtypeStruct((Mp, Dp), out_dtype),
        grid_spec=pltpu.PrefetchScalarGridSpec(
            num_scalar_prefetch=0,
            grid=(steps,),
            in_specs=[row_spec, row_spec, row_spec,     # x, layer_input, pos_emb
                      w_spec, w_spec, bias_spec,        # W1^T, W2^T, (b1+b2)
                      w_spec, bias_spec],               # V^T, bV
            out_specs=row_spec),
        compiler_params=pltpu.CompilerParams(
            dimension_semantics=("parallel",),
            vmem_limit_bytes=vmem_limit),
        cost_estimate=cost,
    )(x2, li2, pos2, w1t, w2t, b12, vt, bv)

    if needs_pad:
        out2 = out2[:M, :D]
    return out2.reshape(S, B, D)


@jax.jit
def _ls_reorder_forward_xla(x, layer_input, position_embedding,
                            w1, b1, w2, b2, v, bv):
    """Fused XLA path for embed_dim < 128 or weights too large for resident VMEM."""
    t = jnp.tanh(layer_input @ w1.T + b1 + x @ w2.T + b2)
    gate = jax.nn.sigmoid(t @ v.T + bv)
    return (gate * position_embedding).astype(x.dtype)


# ----------------------------------------------------------------------------
# Parameter construction (deterministic, stands in for nn.Linear init)
# ----------------------------------------------------------------------------
def make_reordering_params(key, embed_dim, dtype=jnp.float32):
    ks = jax.random.split(key, 6)
    bound = 1.0 / jnp.sqrt(embed_dim)

    def lin(kw, kb):
        w = jax.random.uniform(kw, (embed_dim, embed_dim), dtype, -bound, bound)
        b = jax.random.uniform(kb, (embed_dim,), dtype, -bound, bound)
        return w, b

    w_v, b_v = lin(ks[0], ks[1])
    w_1, b_1 = lin(ks[2], ks[3])
    w_2, b_2 = lin(ks[4], ks[5])
    return {"V_w": w_v, "V_b": b_v,
            "W1_w": w_1, "W1_b": b_1,
            "W2_w": w_2, "W2_b": b_2}


def _pack_params(p, D, Dp, matmul_dtype):
    """One-time per-language packing: transpose, lane-pad to Dp, pre-add b1+b2, cast."""
    def pad_t(w):
        return jnp.zeros((Dp, Dp), jnp.float32).at[:D, :D].set(w.T).astype(matmul_dtype)

    b12 = jnp.zeros((1, Dp), jnp.float32).at[0, :D].set(p["W1_b"] + p["W2_b"])
    bv = jnp.zeros((1, Dp), jnp.float32).at[0, :D].set(p["V_b"])
    return {"W1t": pad_t(p["W1_w"]), "W2t": pad_t(p["W2_w"]),
            "b12": b12, "Vt": pad_t(p["V_w"]), "bV": bv}


class LSReorderingLayerPallas:
    """Language-specific reordering layer: one ReorderingLayer per lang_id.

    matmul_dtype=bf16 (default) is MXU-native on v5e/v6e/v7x (f32 path is for
    validation / exact parity). Output dtype follows x.dtype."""

    def __init__(self, lang_ids, embed_dim, key, matmul_dtype=jnp.bfloat16):
        self.embed_dim = embed_dim
        self.Dp = _round_up(embed_dim, 128)            # lane-dense last dim
        self.matmul_dtype = jnp.dtype(matmul_dtype)
        self.chip = _chip_info()
        self.single_buf = _buffered_supported() if embed_dim >= 128 else False
        self.params = {}      # f32 master params (reference / export / XLA path)
        self.packed = {}      # kernel-ready params (packed ONCE at init)
        for i, lang_id in enumerate(lang_ids):
            p = make_reordering_params(jax.random.fold_in(key, i), embed_dim)
            self.params[str(lang_id)] = p
            if embed_dim >= 128:
                self.packed[str(lang_id)] = _pack_params(
                    p, embed_dim, self.Dp, self.matmul_dtype)

    def _tiling(self, M):
        """Pick (row tile, padded rows) from chip VMEM / core count.
        Returns None if resident weights don't fit (caller uses the XLA path)."""
        Dp = self.Dp
        vmem = self.chip["vmem_bytes"]
        num_tc = self.chip["num_tc"]
        w_isize = self.matmul_dtype.itemsize
        w_bufs = 1 if self.single_buf else 2

        budget = vmem * 3 // 4
        weight_bytes = 3 * Dp * Dp * w_isize * w_bufs + 2 * Dp * 4 * w_bufs
        avail = budget - weight_bytes
        # per-row bytes: x/li/pos/out double-buffered tiles + ~5 f32 intermediates
        per_row = Dp * ((2 * w_isize + 4 + 4) * 2 + 5 * 4)
        if avail < 8 * per_row:
            return None

        # 64-MiB chips (v7x) cap row tiles at 512; 128-MiB chips (v5e/v6e) go to 1024.
        tm_max = 512 if vmem <= (64 << 20) else 1024
        tm = min(tm_max, (avail // per_row) // 8 * 8, _round_up(M, 8))
        tm = max(int(tm), 8)
        steps = pl.cdiv(M, tm)
        # v7x shards the 'parallel' axis across 2 TensorCores: keep step count even.
        if num_tc > 1 and steps > 1 and steps % 2 == 1:
            steps += 1
        return tm, steps * tm

    def __call__(self, x, layer_input, encoder_padding_mask=None,
                 position_embedding=None, langs=None, lang_id=None):
        # Preferred: pass lang_id as a Python int (no device->host sync).
        # Fallback mirrors the PyTorch `langs[0].item()` behaviour.
        if lang_id is None:
            vals = set(int(v) for v in
                       jax.device_get(jnp.asarray(langs)).ravel().tolist())
            assert len(vals) == 1, "all entries of `langs` must be identical"
            lang_id = vals.pop()
        key = str(int(lang_id))
        p = self.params[key]

        S, B, D = x.shape
        assert D == self.embed_dim
        tiling = self._tiling(S * B) if D >= 128 else None
        if tiling is None:
            # D < 128 (lane-padding would waste (128/D)^2 MXU work and ~4x HBM
            # traffic) or weights too large to stay resident in VMEM.
            return _ls_reorder_forward_xla(
                x, layer_input, position_embedding,
                p["W1_w"], p["W1_b"], p["W2_w"], p["W2_b"], p["V_w"], p["V_b"])

        tm, Mp = tiling
        pk = self.packed[key]
        return _ls_reorder_forward(
            x, layer_input, position_embedding,
            pk["W1t"], pk["W2t"], pk["b12"], pk["Vt"], pk["bV"],
            tm=tm, Mp=Mp, Dp=self.Dp, single_buf=self.single_buf,
            vmem_cap=self.chip["vmem_bytes"])


# ----------------------------------------------------------------------------
# Pure-JAX reference for validation
# ----------------------------------------------------------------------------
def reference_forward(x, layer_input, position_embedding, p):
    h = (layer_input @ p["W1_w"].T + p["W1_b"]) + (x @ p["W2_w"].T + p["W2_b"])
    t = jnp.tanh(h)
    gate = jax.nn.sigmoid(t @ p["V_w"].T + p["V_b"])
    return gate * position_embedding


if __name__ == "__main__":
    key = jax.random.PRNGKey(0)

    # Simulated fairseq args: reaction_pairs="aze-eng,bel-eng", encoder_langtok="src",
    # lang2id={"__aze__": 4, "__bel__": 5}  -> lang ids {4, 5}.
    lang_ids = [4, 5]
    seq_len, batch, embed_dim = 8, 2, 128     # D=128 -> lane-dense Pallas path

    kx, kl, kp = jax.random.split(jax.random.fold_in(key, 1), 3)
    x = jax.random.normal(kx, (seq_len, batch, embed_dim), jnp.float32)
    layer_input = jax.random.normal(kl, (seq_len, batch, embed_dim), jnp.float32)
    position_embedding = jax.random.normal(kp, (seq_len, batch, embed_dim), jnp.float32)
    encoder_padding_mask = None  # no pad in this example (unused by forward anyway)

    # --- strict check: f32 matmul path ---
    layer_f32 = LSReorderingLayerPallas(
        lang_ids, embed_dim, jax.random.fold_in(key, 100), matmul_dtype=jnp.float32)
    out = jax.block_until_ready(
        layer_f32(x, layer_input, encoder_padding_mask,
                  position_embedding=position_embedding, lang_id=4))
    ref = reference_forward(x, layer_input, position_embedding, layer_f32.params["4"])
    assert out.shape == x.shape
    assert jnp.allclose(out, ref, atol=1e-4, rtol=1e-4), "f32 path mismatch vs reference"

    # --- loose check: bf16 matmul inputs (MXU-native), f32 accumulation ---
    layer_bf16 = LSReorderingLayerPallas(
        lang_ids, embed_dim, jax.random.fold_in(key, 100), matmul_dtype=jnp.bfloat16)
    out_bf16 = jax.block_until_ready(
        layer_bf16(x, layer_input, encoder_padding_mask,
                   position_embedding=position_embedding, lang_id=5))
    ref5 = reference_forward(x, layer_input, position_embedding, layer_bf16.params["5"])
    assert out_bf16.shape == x.shape
    assert jnp.allclose(out_bf16, ref5, atol=5e-2, rtol=5e-2), "bf16 path mismatch"

    # --- D < 128: fused XLA fallback (Pallas lane-padding would be wasteful) ---
    small = LSReorderingLayerPallas(lang_ids, 32, jax.random.fold_in(key, 200))
    xs = jax.random.normal(kx, (seq_len, batch, 32), jnp.float32)
    ls = jax.random.normal(kl, (seq_len, batch, 32), jnp.float32)
    ps = jax.random.normal(kp, (seq_len, batch, 32), jnp.float32)
    out_s = jax.block_until_ready(
        small(xs, ls, None, position_embedding=ps, lang_id=4))
    refs = reference_forward(xs, ls, ps, small.params["4"])
    assert jnp.allclose(out_s, refs, atol=1e-5, rtol=1e-5), "small-D fallback mismatch"

    print("KERNEL_OK")
</pallas_src>

<mosaic_0001>
module attributes {stable_mosaic.version = 11 : i64} {
  func.func @k(%arg0: i32, %arg1: memref<8x128xf32, #tpu.memory_space<vmem>>, %arg2: memref<8x128xf32, #tpu.memory_space<vmem>>) attributes {dimension_semantics = [#tpu.dimension_semantics<arbitrary>], iteration_bounds = array<i64: 1>, scalar_prefetch = 0 : i64, scratch_operands = 0 : i64, tpu.core_type = #tpu.core_type<tc>, window_params = [{pipeline_mode = #tpu.pipeline_mode<synchronous>, transform_indices = @transform_0, window_bounds = array<i64: 8, 128>}, {pipeline_mode = #tpu.pipeline_mode<synchronous>, transform_indices = @transform_1, window_bounds = array<i64: 8, 128>}]} {
    %c0 = arith.constant 0 : index
    %c0_0 = arith.constant 0 : index
    %0 = vector.load %arg1[%c0, %c0_0] : memref<8x128xf32, #tpu.memory_space<vmem>>, vector<8x128xf32>
    %c0_1 = arith.constant 0 : index
    %c0_2 = arith.constant 0 : index
    %1 = vector.load %arg2[%c0_1, %c0_2] : memref<8x128xf32, #tpu.memory_space<vmem>>, vector<8x128xf32>
    tpu.vector_store %arg2[%c0_1, %c0_2], %0 {strides = array<i32>} : memref<8x128xf32, #tpu.memory_space<vmem>>, vector<8x128xf32>,
    return
  }
  func.func @transform_0(%arg0: i32) -> (i32, i32) {
    %c0_i32 = arith.constant 0 : i32
    %c0_i32_0 = arith.constant 0 : i32
    %c0_i32_1 = arith.constant 0 : i32
    return %c0_i32, %c0_i32_0 : i32, i32
  }
  func.func @transform_1(%arg0: i32) -> (i32, i32) {
    %c0_i32 = arith.constant 0 : i32
    %c0_i32_0 = arith.constant 0 : i32
    %c0_i32_1 = arith.constant 0 : i32
    return %c0_i32, %c0_i32_0 : i32, i32
  }
}

module attributes {stable_mosaic.version = 11 : i64} {
  func.func @_reordering_kernel(%arg0: i32, %arg1: memref<16x128xf32, #tpu.memory_space<vmem>>, %arg2: memref<16x128xf32, #tpu.memory_space<vmem>>, %arg3: memref<16x128xf32, #tpu.memory_space<vmem>>, %arg4: memref<128x128xf32, #tpu.memory_space<vmem>>, %arg5: memref<128x128xf32, #tpu.memory_space<vmem>>, %arg6: memref<1x128xf32, #tpu.memory_space<vmem>>, %arg7: memref<128x128xf32, #tpu.memory_space<vmem>>, %arg8: memref<1x128xf32, #tpu.memory_space<vmem>>, %arg9: memref<16x128xf32, #tpu.memory_space<vmem>>) attributes {dimension_semantics = [#tpu.dimension_semantics<parallel>], iteration_bounds = array<i64: 1>, scalar_prefetch = 0 : i64, scratch_operands = 0 : i64, tpu.core_type = #tpu.core_type<tc>, window_params = [{transform_indices = @transform_0, window_bounds = array<i64: 16, 128>}, {transform_indices = @transform_1, window_bounds = array<i64: 16, 128>}, {transform_indices = @transform_2, window_bounds = array<i64: 16, 128>}, {pipeline_mode = #tpu.pipeline_mode<synchronous>, transform_indices = @transform_3, window_bounds = array<i64: 128, 128>}, {pipeline_mode = #tpu.pipeline_mode<synchronous>, transform_indices = @transform_4, window_bounds = array<i64: 128, 128>}, {pipeline_mode = #tpu.pipeline_mode<synchronous>, transform_indices = @transform_5, window_bounds = array<i64: 1, 128>}, {pipeline_mode = #tpu.pipeline_mode<synchronous>, transform_indices = @transform_6, window_bounds = array<i64: 128, 128>}, {pipeline_mode = #tpu.pipeline_mode<synchronous>, transform_indices = @transform_7, window_bounds = array<i64: 1, 128>}, {transform_indices = @transform_8, window_bounds = array<i64: 16, 128>}]} {
    %c0 = arith.constant 0 : index
    %c0_0 = arith.constant 0 : index
    %0 = vector.load %arg2[%c0, %c0_0] : memref<16x128xf32, #tpu.memory_space<vmem>>, vector<16x128xf32>
    %c0_1 = arith.constant 0 : index
    %c0_2 = arith.constant 0 : index
    %1 = vector.load %arg4[%c0_1, %c0_2] : memref<128x128xf32, #tpu.memory_space<vmem>>, vector<128x128xf32>
    %cst = arith.constant dense<0.000000e+00> : vector<16x128xf32>
    %2 = tpu.matmul %0, %1, %cst {dimension_numbers = #tpu.dot_dimension_numbers<[1], [0], [0], [1], [0, 0, 1, 1], [], []>} : vector<16x128xf32>, vector<128x128xf32>, vector<16x128xf32> -> vector<16x128xf32>
    %c0_3 = arith.constant 0 : index
    %c0_4 = arith.constant 0 : index
    %3 = vector.load %arg1[%c0_3, %c0_4] : memref<16x128xf32, #tpu.memory_space<vmem>>, vector<16x128xf32>
    %c0_5 = arith.constant 0 : index
    %c0_6 = arith.constant 0 : index
    %4 = vector.load %arg5[%c0_5, %c0_6] : memref<128x128xf32, #tpu.memory_space<vmem>>, vector<128x128xf32>
    %cst_7 = arith.constant dense<0.000000e+00> : vector<16x128xf32>
    %5 = tpu.matmul %3, %4, %cst_7 {dimension_numbers = #tpu.dot_dimension_numbers<[1], [0], [0], [1], [0, 0, 1, 1], [], []>} : vector<16x128xf32>, vector<128x128xf32>, vector<16x128xf32> -> vector<16x128xf32>
    %6 = arith.addf %2, %5 : vector<16x128xf32>
    %c0_8 = arith.constant 0 : index
    %c0_9 = arith.constant 0 : index
    %7 = vector.load %arg6[%c0_8, %c0_9] : memref<1x128xf32, #tpu.memory_space<vmem>>, vector<1x128xf32>
    %8 = vector.broadcast %7 : vector<1x128xf32> to vector<16x128xf32>
    %9 = arith.addf %6, %8 : vector<16x128xf32>
    %10 = math.tanh %9 : vector<16x128xf32>
    %c0_10 = arith.constant 0 : index
    %c0_11 = arith.constant 0 : index
    %11 = vector.load %arg7[%c0_10, %c0_11] : memref<128x128xf32, #tpu.memory_space<vmem>>, vector<128x128xf32>
    %cst_12 = arith.constant dense<0.000000e+00> : vector<16x128xf32>
    %12 = tpu.matmul %10, %11, %cst_12 {dimension_numbers = #tpu.dot_dimension_numbers<[1], [0], [0], [1], [0, 0, 1, 1], [], []>} : vector<16x128xf32>, vector<128x128xf32>, vector<16x128xf32> -> vector<16x128xf32>
    %c0_13 = arith.constant 0 : index
    %c0_14 = arith.constant 0 : index
    %13 = vector.load %arg8[%c0_13, %c0_14] : memref<1x128xf32, #tpu.memory_space<vmem>>, vector<1x128xf32>
    %14 = vector.broadcast %13 : vector<1x128xf32> to vector<16x128xf32>
    %15 = arith.addf %12, %14 : vector<16x128xf32>
    %16 = arith.negf %15 : vector<16x128xf32>
    %17 = math.exp %16 : vector<16x128xf32>
    %cst_15 = arith.constant 1.000000e+00 : f32
    %18 = vector.broadcast %cst_15 : f32 to vector<16x128xf32>
    %19 = arith.addf %18, %17 : vector<16x128xf32>
    %20 = arith.divf %18, %19 : vector<16x128xf32>
    %c0_16 = arith.constant 0 : index
    %c0_17 = arith.constant 0 : index
    %21 = vector.load %arg3[%c0_16, %c0_17] : memref<16x128xf32, #tpu.memory_space<vmem>>, vector<16x128xf32>
    %22 = arith.mulf %20, %21 : vector<16x128xf32>
    %c0_18 = arith.constant 0 : index
    %c0_19 = arith.constant 0 : index
    %23 = vector.load %arg9[%c0_18, %c0_19] : memref<16x128xf32, #tpu.memory_space<vmem>>, vector<16x128xf32>
    tpu.vector_store %arg9[%c0_18, %c0_19], %22 {strides = array<i32>} : memref<16x128xf32, #tpu.memory_space<vmem>>, vector<16x128xf32>,
    return
  }
  func.func @transform_0(%arg0: i32) -> (i32, i32) {
    %c0_i32 = arith.constant 0 : i32
    %c0_i32_0 = arith.constant 0 : i32
    return %arg0, %c0_i32 : i32, i32
  }
  func.func @transform_1(%arg0: i32) -> (i32, i32) {
    %c0_i32 = arith.constant 0 : i32
    %c0_i32_0 = arith.constant 0 : i32
    return %arg0, %c0_i32 : i32, i32
  }
  func.func @transform_2(%arg0: i32) -> (i32, i32) {
    %c0_i32 = arith.constant 0 : i32
    %c0_i32_0 = arith.constant 0 : i32
    return %arg0, %c0_i32 : i32, i32
  }
  func.func @transform_3(%arg0: i32) -> (i32, i32) {
    %c0_i32 = arith.constant 0 : i32
    %c0_i32_0 = arith.constant 0 : i32
    %c0_i32_1 = arith.constant 0 : i32
    return %c0_i32, %c0_i32_0 : i32, i32
  }
  func.func @transform_4(%arg0: i32) -> (i32, i32) {
    %c0_i32 = arith.constant 0 : i32
    %c0_i32_0 = arith.constant 0 : i32
    %c0_i32_1 = arith.constant 0 : i32
    return %c0_i32, %c0_i32_0 : i32, i32
  }
  func.func @transform_5(%arg0: i32) -> (i32, i32) {
    %c0_i32 = arith.constant 0 : i32
    %c0_i32_0 = arith.constant 0 : i32
    %c0_i32_1 = arith.constant 0 : i32
    return %c0_i32, %c0_i32_0 : i32, i32
  }
  func.func @transform_6(%arg0: i32) -> (i32, i32) {
    %c0_i32 = arith.constant 0 : i32
    %c0_i32_0 = arith.constant 0 : i32
    %c0_i32_1 = arith.constant 0 : i32
    return %c0_i32, %c0_i32_0 : i32, i32
  }
  func.func @transform_7(%arg0: i32) -> (i32, i32) {
    %c0_i32 = arith.constant 0 : i32
    %c0_i32_0 = arith.constant 0 : i32
    %c0_i32_1 = arith.constant 0 : i32
    return %c0_i32, %c0_i32_0 : i32, i32
  }
  func.func @transform_8(%arg0: i32) -> (i32, i32) {
    %c0_i32 = arith.constant 0 : i32
    %c0_i32_0 = arith.constant 0 : i32
    return %arg0, %c0_i32 : i32, i32
  }
}

</mosaic_0001>

<bundles_post_ra>
// kernel: tpu_custom_call.1
= control target key start
LH: loop header
LB: loop body
LE: loop exit
PB: predicated region body
PF: predicated region fallthrough
CT: control target
= control target key end

     0   :  { %6 = vsyncpa [#allocation3], 0  ;;  %s102_s0 = inlined_call_operand.hbm [shape: f32[8,128], index: 0, kind: input, shape index: {}]   ;;  %s103_s1 = inlined_call_operand.hbm [shape: f32[8,128], index: 1, kind: output, shape index: {}]  }
   0x1   :  { %7 = vsyncpa [#allocation4], 0  ;;  %s84_s6 = smov [#allocation2]  }
   0x2   :  { %s14_s7 = sshll.u32 %s84_s6, 4  ;;  %s15_s7 = int_to_ptr.vmem [resolvable:$true] %s14_s7 }
   0x3   :  { %s48_s8 = scalar_lea.vmem %s15_s7, 128  ;;  %p53_p1 = scmp.lt.s32.totalorder %s15_s7, %s15_s7 }
   0x4   :  { %p49_p0 = scmp.ne.s32.totalorder %s15_s7, %s48_s8  ;;  %p54_p2 = scmp.lt.s32.totalorder %s48_s8, %s48_s8 }
   0x6   :  { %p55_p3 = por %p54_p2, %p53_p1 }
   0x8   :  { %p56_p4 = pnand %p55_p3, %p49_p0 }
   0xa   :  { %59 = shalt.err (!%p56_p4)
}
   0xb   :  { %17 = dma.hbm_to_vmem [thread:$0]  %s102_s0, 128, %s15_s7, [#allocation3]  }
   0xc   :  { %80 = dma.done.wait [#allocation3], 128  }
   0xd   :  { %81 = vsyncadd [#allocation3], 4294967168  ;;  %s85_s11 = smov [#allocation5]   ;;  %v21_v0 = vld [vmem:[#allocation2] sm:$0xff] }
   0xe   :  { %s29_s12 = sshll.u32 %s85_s11, 4  ;;  %22 = vst [vmem:[#allocation5] sm:$0xff] %v21_v0  ;;  %s30_s12 = int_to_ptr.vmem [resolvable:$true] %s29_s12 }
   0xf   :  { %s60_s13 = scalar_lea.vmem %s30_s12, 128  ;;  %p65_p6 = scmp.lt.s32.totalorder %s30_s12, %s30_s12 }
  0x10   :  { %p61_p5 = scmp.ne.s32.totalorder %s30_s12, %s60_s13  ;;  %p66_p7 = scmp.lt.s32.totalorder %s60_s13, %s60_s13 }
  0x12   :  { %p67_p8 = por %p66_p7, %p65_p6 }
  0x14   :  { %p68_p9 = pnand %p67_p8, %p61_p5 }
  0x16   :  { %71 = shalt.err (!%p68_p9)
}
  0x17   :  { %32 = dma.vmem_to_hbm [thread:$0]  %s30_s12, 128, %s103_s1, [#allocation4]  }
  0x18   :  { %82 = dma.done.wait [#allocation4], 128  }
  0x19   :  { %83 = vsyncadd [#allocation4], 4294967168 }
  0x1a   :  { %36 = vsyncpa [#allocation3], 1 }
  0x1b   :  { %37 = vsyncpa [#allocation4], 1 }

// kernel: _ls_reorder_forward.1
= control target key start
LH: loop header
LB: loop body
LE: loop exit
PB: predicated region body
PF: predicated region fallthrough
CT: control target
= control target key end

     0   :  { %13 = vsyncpa [#allocation3], 0  ;;  %s881_s0 = inlined_call_operand.hbm [shape: f32[16,128], index: 0, kind: input, shape index: {}]   ;;  %s882_s1 = inlined_call_operand.hbm [shape: f32[16,128], index: 1, kind: input, shape index: {}]   ;;  %s883_s2 = inlined_call_operand.hbm [shape: f32[16,128], index: 2, kind: input, shape index: {}]   ;;  %s884_s3 = inlined_call_operand.hbm [shape: f32[128,128], index: 3, kind: input, shape index: {}]   ;;  %s885_s4 = inlined_call_operand.hbm [shape: f32[128,128], index: 4, kind: input, shape index: {}]   ;;  %s886_s5 = inlined_call_operand.vmem [shape: f32[1,128], index: 5, kind: input, shape index: {}]   ;;  %s887_s6 = inlined_call_operand.hbm [shape: f32[128,128], index: 6, kind: input, shape index: {}]   ;;  %s888_s7 = inlined_call_operand.vmem [shape: f32[1,128], index: 7, kind: input, shape index: {}]   ;;  %s889_s8 = inlined_call_operand.hbm [shape: f32[16,128], index: 8, kind: output, shape index: {}]  }
   0x1   :  { %14 = vsyncpa [#allocation6], 0 }
   0x2   :  { %15 = vsyncpa [#allocation9], 0 }
   0x3   :  { %16 = vsyncpa [#allocation12], 0 }
   0x4   :  { %17 = vsyncpa [#allocation4], 0  ;;  %s779_s27 = smov [#allocation5]   ;;  %s780_s29 = smov [#allocation8]  }
   0x5   :  { %s35_s28 = sshll.u32 %s779_s27, 4  ;;  %s59_s30 = sshll.u32 %s780_s29, 4  ;;  %s36_s28 = int_to_ptr.vmem [resolvable:$true] %s35_s28  ;;  %s60_s30 = int_to_ptr.vmem [resolvable:$true] %s59_s30 }
   0x6   :  { %s637_s9 = scalar_lea.vmem %s36_s28, 256  ;;  %p642_p1 = scmp.lt.s32.totalorder %s36_s28, %s36_s28 }
   0x7   :  { %p638_p0 = scmp.ne.s32.totalorder %s36_s28, %s637_s9  ;;  %p643_p2 = scmp.lt.s32.totalorder %s637_s9, %s637_s9 }
   0x9   :  { %p644_p3 = por %p643_p2, %p642_p1 }
   0xb   :  { %p645_p4 = pnand %p644_p3, %p638_p0 }
   0xd   :  { %648 = shalt.err (!%p645_p4)
}
   0xe   :  { %s781_s10 = smov 128   ;;  %s782_s11 = smov 8  }
   0xf   :  { %41 = dma.hbm_to_vmem [thread:$0]  %s882_s1, 256, %s36_s28, [#allocation6], %s781_s10, %s781_s10, %s782_s11  }
  0x10   :  { %s657_s14 = scalar_lea.vmem %s60_s30, 2048  ;;  %p662_p6 = scmp.lt.s32.totalorder %s60_s30, %s60_s30 }
  0x11   :  { %p658_p5 = scmp.ne.s32.totalorder %s60_s30, %s657_s14  ;;  %p663_p7 = scmp.lt.s32.totalorder %s657_s14, %s657_s14 }
  0x13   :  { %p664_p8 = por %p663_p7, %p662_p6 }
  0x15   :  { %p665_p9 = pnand %p664_p8, %p658_p5 }
  0x17   :  { %668 = shalt.err (!%p665_p9)
}
  0x18   :  { %65 = dma.hbm_to_vmem [thread:$0]  %s884_s3, 2048, %s60_s30, [#allocation9], %s781_s10, %s781_s10, %s782_s11  }
  0x19   :  { %s783_s17 = smov [#allocation2]   ;;  %s784_s19 = smov [#allocation7]  }
  0x1a   :  { %s23_s18 = sshll.u32 %s783_s17, 4  ;;  %s47_s20 = sshll.u32 %s784_s19, 4  ;;  %s24_s18 = int_to_ptr.vmem [resolvable:$true] %s23_s18  ;;  %s48_s20 = int_to_ptr.vmem [resolvable:$true] %s47_s20 }
  0x1b   :  { %s677_s1 = scalar_lea.vmem %s24_s18, 256  ;;  %p682_p11 = scmp.lt.s32.totalorder %s24_s18, %s24_s18 }
  0x1c   :  { %p678_p10 = scmp.ne.s32.totalorder %s24_s18, %s677_s1  ;;  %p683_p12 = scmp.lt.s32.totalorder %s677_s1, %s677_s1 }
  0x1e   :  { %p684_p13 = por %p683_p12, %p682_p11 }
  0x20   :  { %p685_p0 = pnand %p684_p13, %p678_p10 }
  0x22   :  { %688 = shalt.err (!%p685_p0)
}
  0x23   :  { %29 = dma.hbm_to_vmem [thread:$0]  %s881_s0, 256, %s24_s18, [#allocation3], %s781_s10, %s781_s10, %s782_s11  }
  0x24   :  { %s697_s3 = scalar_lea.vmem %s48_s20, 256  ;;  %p702_p2 = scmp.lt.s32.totalorder %s48_s20, %s48_s20 }
  0x25   :  { %p698_p1 = scmp.ne.s32.totalorder %s48_s20, %s697_s3  ;;  %p703_p3 = scmp.lt.s32.totalorder %s697_s3, %s697_s3 }
  0x27   :  { %p704_p4 = por %p703_p3, %p702_p2 }
  0x29   :  { %p705_p5 = pnand %p704_p4, %p698_p1 }
  0x2b   :  { %708 = shalt.err (!%p705_p5)
}
  0x2c   :  { %53 = dma.hbm_to_vmem [thread:$0]  %s883_s2, 256, %s48_s20, [#allocation6], %s781_s10, %s781_s10, %s782_s11  }
  0x2d   :  { %s785_s25 = smov [#allocation10]   ;;  %s786_s27 = smov [#allocation11]  }
  0x2e   :  { %s71_s26 = sshll.u32 %s785_s25, 4  ;;  %s85_s28 = sshll.u32 %s786_s27, 4  ;;  %s72_s26 = int_to_ptr.vmem [resolvable:$true] %s71_s26  ;;  %s86_s28 = int_to_ptr.vmem [resolvable:$true] %s85_s28 }
  0x2f   :  { %s717_s0 = scalar_lea.vmem %s72_s26, 2048  ;;  %p722_p7 = scmp.lt.s32.totalorder %s72_s26, %s72_s26 }
  0x30   :  { %p718_p6 = scmp.ne.s32.totalorder %s72_s26, %s717_s0  ;;  %p723_p8 = scmp.lt.s32.totalorder %s717_s0, %s717_s0 }
  0x32   :  { %p724_p9 = por %p723_p8, %p722_p7 }
  0x34   :  { %p725_p10 = pnand %p724_p9, %p718_p6 }
  0x36   :  { %728 = shalt.err (!%p725_p10)
}
  0x37   :  { %77 = dma.hbm_to_vmem [thread:$0]  %s885_s4, 2048, %s72_s26, [#allocation9], %s781_s10, %s781_s10, %s782_s11  }
  0x38   :  { %s737_s2 = scalar_lea.vmem %s86_s28, 2048  ;;  %p742_p12 = scmp.lt.s32.totalorder %s86_s28, %s86_s28 }
  0x39   :  { %p738_p11 = scmp.ne.s32.totalorder %s86_s28, %s737_s2  ;;  %p743_p13 = scmp.lt.s32.totalorder %s737_s2, %s737_s2 }
  0x3b   :  { %p744_p0 = por %p743_p13, %p742_p12 }
  0x3d   :  { %p745_p1 = pnand %p744_p0, %p738_p11 }
  0x3f   :  { %748 = shalt.err (!%p745_p1)
}
  0x40   :  { %91 = dma.hbm_to_vmem [thread:$0]  %s887_s6, 2048, %s86_s28, [#allocation12], %s781_s10, %s781_s10, %s782_s11  }
  0x41   :  { %769 = dma.done.wait [#allocation3], 256  }
  0x42   :  { %770 = vsyncadd [#allocation3], 4294967040 }
  0x43   :  { %771 = dma.done.wait [#allocation6], 512  }
  0x44   :  { %772 = vsyncadd [#allocation6], 4294966784 }
  0x45   :  { %773 = dma.done.wait [#allocation9], 4096  }
  0x46   :  { %774 = vsyncadd [#allocation9], 4294963200 }
  0x47   :  { %775 = dma.done.wait [#allocation12], 2048  }
  0x48   :  { %776 = vsyncadd [#allocation12], 4294965248  ;;  %v147_v0 = vld [vmem:[#allocation10 + $0x78] sm:$0xff]  ;;  %v146_v2 = vld [vmem:[#allocation10 + $0x70] sm:$0xff] }
  0x49   :  { %v129_v1 = vld [vmem:[#allocation8 + $0x78] sm:$0xff]  ;;  %503 = vmatprep.subr.mxu0 %v147_v0  ;;  %v128_v3 = vld [vmem:[#allocation8 + $0x70] sm:$0xff]  ;;  %v145_v4 = vld [vmem:[#allocation10 + $0x68] sm:$0xff] }
  0x4a   :  { %538 = vmatprep.subr.mxu1 %v129_v1  ;;  %504 = vmatpush3.msra.mxu0 %v147_v0  ;;  %v127_v5 = vld [vmem:[#allocation8 + $0x68] sm:$0xff]  ;;  %v144_v6 = vld [vmem:[#allocation10 + $0x60] sm:$0xff]  ;;  %v143_v8 = vld [vmem:[#allocation10 + $0x58] sm:$0xff] }
  0x4b   :  { %539 = vmatpush3.msra.mxu1 %v129_v1  ;;  %505 = vmatprep.subr.mxu0 %v146_v2  ;;  %v126_v7 = vld [vmem:[#allocation8 + $0x60] sm:$0xff]  ;;  %v125_v9 = vld [vmem:[#allocation8 + $0x58] sm:$0xff]  ;;  %v142_v10 = vld [vmem:[#allocation10 + $0x50] sm:$0xff] }
  0x4c   :  { %540 = vmatprep.subr.mxu1 %v128_v3  ;;  %506 = vmatpush3.msra.mxu0 %v146_v2  ;;  %v124_v11 = vld [vmem:[#allocation8 + $0x50] sm:$0xff]  ;;  %v141_v12 = vld [vmem:[#allocation10 + $0x48] sm:$0xff]  ;;  %v140_v14 = vld [vmem:[#allocation10 + $0x40] sm:$0xff] }
  0x4d   :  { %541 = vmatpush3.msra.mxu1 %v128_v3  ;;  %507 = vmatprep.subr.mxu0 %v145_v4  ;;  %v123_v13 = vld [vmem:[#allocation8 + $0x48] sm:$0xff]  ;;  %v122_v15 = vld [vmem:[#allocation8 + $0x40] sm:$0xff]  ;;  %v139_v16 = vld [vmem:[#allocation10 + $0x38] sm:$0xff] }
  0x4e   :  { %542 = vmatprep.subr.mxu1 %v127_v5  ;;  %508 = vmatpush3.msra.mxu0 %v145_v4  ;;  %v121_v17 = vld [vmem:[#allocation8 + $0x38] sm:$0xff]  ;;  %v138_v18 = vld [vmem:[#allocation10 + $0x30] sm:$0xff]  ;;  %v137_v20 = vld [vmem:[#allocation10 + $0x28] sm:$0xff] }
  0x4f   :  { %543 = vmatpush3.msra.mxu1 %v127_v5  ;;  %509 = vmatprep.subr.mxu0 %v144_v6  ;;  %v120_v19 = vld [vmem:[#allocation8 + $0x30] sm:$0xff]  ;;  %v119_v21 = vld [vmem:[#allocation8 + $0x28] sm:$0xff]  ;;  %v136_v22 = vld [vmem:[#allocation10 + $0x20] sm:$0xff] }
  0x50   :  { %544 = vmatprep.subr.mxu1 %v126_v7  ;;  %510 = vmatpush3.msra.mxu0 %v144_v6  ;;  %v118_v23 = vld [vmem:[#allocation8 + $0x20] sm:$0xff]  ;;  %v135_v24 = vld [vmem:[#allocation10 + $0x18] sm:$0xff]  ;;  %v134_v26 = vld [vmem:[#allocation10 + $0x10] sm:$0xff] }
  0x51   :  { %545 = vmatpush3.msra.mxu1 %v126_v7  ;;  %511 = vmatprep.subr.mxu0 %v143_v8  ;;  %v117_v25 = vld [vmem:[#allocation8 + $0x18] sm:$0xff]  ;;  %v116_v27 = vld [vmem:[#allocation8 + $0x10] sm:$0xff]  ;;  %v133_v28 = vld [vmem:[#allocation10 + $0x8] sm:$0xff] }
  0x52   :  { %546 = vmatprep.subr.mxu1 %v125_v9  ;;  %512 = vmatpush3.msra.mxu0 %v143_v8  ;;  %v115_v29 = vld [vmem:[#allocation8 + $0x8] sm:$0xff]  ;;  %v132_v30 = vld [vmem:[#allocation10] sm:$0xff]  ;;  %v130_v32 = vld [vmem:[#allocation2] sm:$0xff] }
  0x53   :  { %547 = vmatpush3.msra.mxu1 %v125_v9  ;;  %513 = vmatprep.subr.mxu0 %v142_v10  ;;  %v114_v31 = vld [vmem:[#allocation8] sm:$0xff]  ;;  %v131_v34 = vld [vmem:[#allocation2 + $0x8] sm:$0xff]  ;;  %v113_v35 = vld [vmem:[#allocation5 + $0x8] sm:$0xff] }
  0x54   :  { %548 = vmatprep.subr.mxu1 %v124_v11  ;;  %514 = vmatpush3.msra.mxu0 %v142_v10  ;;  %v112_v33 = vld [vmem:[#allocation5] sm:$0xff]  ;;  %v324_v36 = vld [vmem:[#allocation11 + $0x78] sm:$0xff]  ;;  %v323_v37 = vld [vmem:[#allocation11 + $0x70] sm:$0xff] }
  0x55   :  { %549 = vmatpush3.msra.mxu1 %v124_v11  ;;  %515 = vmatprep.subr.mxu0 %v141_v12  ;;  %v322_v38 = vld [vmem:[#allocation11 + $0x68] sm:$0xff]  ;;  %v321_v39 = vld [vmem:[#allocation11 + $0x60] sm:$0xff]  ;;  %v320_v40 = vld [vmem:[#allocation11 + $0x58] sm:$0xff] }
  0x56   :  { %550 = vmatprep.subr.mxu1 %v123_v13  ;;  %516 = vmatpush3.msra.mxu0 %v141_v12  ;;  %v319_v41 = vld [vmem:[#allocation11 + $0x50] sm:$0xff]  ;;  %v318_v42 = vld [vmem:[#allocation11 + $0x48] sm:$0xff]  ;;  %v317_v43 = vld [vmem:[#allocation11 + $0x40] sm:$0xff] }
  0x57   :  { %551 = vmatpush3.msra.mxu1 %v123_v13  ;;  %517 = vmatprep.subr.mxu0 %v140_v14  ;;  %v316_v44 = vld [vmem:[#allocation11 + $0x38] sm:$0xff]  ;;  %v315_v45 = vld [vmem:[#allocation11 + $0x30] sm:$0xff]  ;;  %v314_v46 = vld [vmem:[#allocation11 + $0x28] sm:$0xff] }
  0x58   :  { %552 = vmatprep.subr.mxu1 %v122_v15  ;;  %518 = vmatpush3.msra.mxu0 %v140_v14  ;;  %v313_v47 = vld [vmem:[#allocation11 + $0x20] sm:$0xff]  ;;  %v312_v48 = vld [vmem:[#allocation11 + $0x18] sm:$0xff]  ;;  %v311_v49 = vld [vmem:[#allocation11 + $0x10] sm:$0xff] }
  0x59   :  { %553 = vmatpush3.msra.mxu1 %v122_v15  ;;  %519 = vmatprep.subr.mxu0 %v139_v16  ;;  %v310_v50 = vld [vmem:[#allocation11 + $0x8] sm:$0xff]  ;;  %v309_v51 = vld [vmem:[#allocation11] sm:$0xff]  ;;  %v445_v55 = vld [vmem:[%s886_s5] ss:$0 sm:$0xff]  ;;  %s787_s5 = smov [#allocation13]  }
  0x5a   :  { %554 = vmatprep.subr.mxu1 %v121_v17  ;;  %520 = vmatpush3.msra.mxu0 %v139_v16  ;;  %v446_v63 = vld [vmem:[%s888_s7] ss:$0 sm:$0xff]  ;;  %v420_v10 = vld [vmem:[#allocation7 + $0x8] sm:$0xff]  ;;  %s430_s15 = sshll.u32 %s787_s5, 4  ;;  %s431_s15 = int_to_ptr.vmem [resolvable:$true] %s430_s15 }
  0x5b   :  { %555 = vmatpush3.msra.mxu1 %v121_v17  ;;  %521 = vmatprep.subr.mxu0 %v138_v18  ;;  %v419_v12 = vld [vmem:[#allocation7] sm:$0xff]  ;;  %s749_s7 = scalar_lea.vmem %s431_s15, 256  ;;  %p754_p3 = scmp.lt.s32.totalorder %s431_s15, %s431_s15 }
  0x5c   :  { %556 = vmatprep.subr.mxu1 %v120_v19  ;;  %522 = vmatpush3.msra.mxu0 %v138_v18  ;;  %p750_p2 = scmp.ne.s32.totalorder %s431_s15, %s749_s7  ;;  %p755_p4 = scmp.lt.s32.totalorder %s749_s7, %s749_s7 }
  0x5d   :  { %557 = vmatpush3.msra.mxu1 %v120_v19  ;;  %523 = vmatprep.subr.mxu0 %v137_v20 }
  0x5e   :  { %558 = vmatprep.subr.mxu1 %v119_v21  ;;  %524 = vmatpush3.msra.mxu0 %v137_v20  ;;  %p756_p5 = por %p755_p4, %p754_p3 }
  0x5f   :  { %559 = vmatpush3.msra.mxu1 %v119_v21  ;;  %525 = vmatprep.subr.mxu0 %v136_v22 }
  0x60   :  { %560 = vmatprep.subr.mxu1 %v118_v23  ;;  %526 = vmatpush3.msra.mxu0 %v136_v22  ;;  %p757_p6 = pnand %p756_p5, %p750_p2 }
  0x61   :  { %561 = vmatpush3.msra.mxu1 %v118_v23  ;;  %527 = vmatprep.subr.mxu0 %v135_v24 }
  0x62   :  { %562 = vmatprep.subr.mxu1 %v117_v25  ;;  %528 = vmatpush3.msra.mxu0 %v135_v24 }
  0x63   :  { %563 = vmatpush3.msra.mxu1 %v117_v25  ;;  %529 = vmatprep.subr.mxu0 %v134_v26 }
  0x64   :  { %564 = vmatprep.subr.mxu1 %v116_v27  ;;  %530 = vmatpush3.msra.mxu0 %v134_v26 }
  0x65   :  { %565 = vmatpush3.msra.mxu1 %v116_v27  ;;  %531 = vmatprep.subr.mxu0 %v133_v28 }
  0x66   :  { %566 = vmatprep.subr.mxu1 %v115_v29  ;;  %532 = vmatpush3.msra.mxu0 %v133_v28 }
  0x67   :  { %567 = vmatpush3.msra.mxu1 %v115_v29  ;;  %533 = vmatprep.subr.mxu0 %v132_v30 }
  0x68   :  { %568 = vmatprep.subr.mxu1 %v114_v31  ;;  %534 = vmatpush3.msra.mxu0 %v132_v30 }
  0x69   :  { %535 = vmatprep.mubr.f32.mxu0 %v130_v32  ;;  %569 = vmatpush3.msra.mxu1 %v114_v31 }
  0x6a   :  { %570 = vmatprep.mubr.f32.mxu1 %v112_v33  ;;  %536 = vmatmul.mubr.f32.vlgmr.msra.gmra.mxu0 %v131_v34 }
  0x6b   :  { %571 = vmatmul.mubr.f32.vlgmr.msra.gmra.mxu1 %v113_v35  ;;  %573 = vmatprep.subr.mxu0 %v324_v36 }
  0x6c   :  { %574 = vmatpush3.msra.mxu0 %v324_v36 }
  0x6d   :  { %575 = vmatprep.subr.mxu0 %v323_v37 }
  0x6e   :  { %576 = vmatpush3.msra.mxu0 %v323_v37 }
  0x6f   :  { %577 = vmatprep.subr.mxu0 %v322_v38 }
  0x70   :  { %578 = vmatpush3.msra.mxu0 %v322_v38 }
  0x71   :  { %579 = vmatprep.subr.mxu0 %v321_v39 }
  0x72   :  { %580 = vmatpush3.msra.mxu0 %v321_v39 }
  0x73   :  { %581 = vmatprep.subr.mxu0 %v320_v40 }
  0x74   :  { %582 = vmatpush3.msra.mxu0 %v320_v40 }
  0x75   :  { %583 = vmatprep.subr.mxu0 %v319_v41 }
  0x76   :  { %584 = vmatpush3.msra.mxu0 %v319_v41 }
  0x77   :  { %585 = vmatprep.subr.mxu0 %v318_v42 }
  0x78   :  { %586 = vmatpush3.msra.mxu0 %v318_v42 }
  0x79   :  { %587 = vmatprep.subr.mxu0 %v317_v43 }
  0x7a   :  { %588 = vmatpush3.msra.mxu0 %v317_v43 }
  0x7b   :  { %589 = vmatprep.subr.mxu0 %v316_v44 }
  0x7c   :  { %590 = vmatpush3.msra.mxu0 %v316_v44 }
  0x7d   :  { %591 = vmatprep.subr.mxu0 %v315_v45 }
  0x7e   :  { %592 = vmatpush3.msra.mxu0 %v315_v45 }
  0x7f   :  { %593 = vmatprep.subr.mxu0 %v314_v46 }
  0x80   :  { %594 = vmatpush3.msra.mxu0 %v314_v46 }
  0x81   :  { %595 = vmatprep.subr.mxu0 %v313_v47 }
  0x82   :  { %596 = vmatpush3.msra.mxu0 %v313_v47 }
  0x83   :  { %597 = vmatprep.subr.mxu0 %v312_v48 }
  0x84   :  { %598 = vmatpush3.msra.mxu0 %v312_v48 }
  0x85   :  { %599 = vmatprep.subr.mxu0 %v311_v49 }
  0x86   :  { %600 = vmatpush3.msra.mxu0 %v311_v49 }
  0x87   :  { %601 = vmatprep.subr.mxu0 %v310_v50 }
  0x88   :  { %602 = vmatpush3.msra.mxu0 %v310_v50 }
  0x89   :  { %603 = vmatprep.subr.mxu0 %v309_v51 }
  0x8a   :  { %604 = vmatpush3.msra.mxu0 %v309_v51 }
 0x12a   :  { %v537_v52 = vpop.f32.mrf.mxu0 }
 0x12b   :  { %v572_v53 = vpop.f32.mrf.mxu1 }
 0x12c   :  { %v295_v54 = vadd.f32 %v572_v53, %v537_v52  ;;  %v214_v56 = vpop.f32.mrf.mxu0 }
 0x12d   :  { %v289_v57 = vpop.f32.mrf.mxu1 }
 0x12e   :  { %v290_v58 = vadd.f32 %v289_v57, %v214_v56  ;;  %v306_v59 = vadd.f32 %v445_v55, %v295_v54 }
 0x130   :  { %v305_v60 = vadd.f32 %v445_v55, %v290_v58 }
 0x132   :  { %617 = vtanh.f32 %v305_v60 }
 0x133   :  { %619 = vtanh.f32 %v306_v59 }
 0x13f   :  { %v618_v61 = vpop.eup %617 }
 0x140   :  { %v620_v62 = vpop.eup %619  ;;  %605 = vmatprep.mubr.f32.mxu0 %v618_v61 }
 0x141   :  { %606 = vmatmul.mubr.f32.vlgmr.msra.gmra.mxu0 %v620_v62 }
 0x201   :  { %v607_v0 = vpop.f32.mrf.mxu0 }
 0x202   :  { %v404_v1 = vadd.f32 %v607_v0, %v446_v63 }
 0x203   :  { %v398_v2 = vpop.f32.mrf.mxu0 }
 0x204   :  { %v448_v3 = vmul.f32 -1.442695, %v404_v1  ;;  %v399_v4 = vadd.f32 %v446_v63, %v398_v2 }
 0x206   :  { %621 = vpow2.f32 %v448_v3  ;;  %v447_v5 = vmul.f32 -1.442695, %v399_v4 }
 0x208   :  { %623 = vpow2.f32 %v447_v5 }
 0x213   :  { %v622_v6 = vpop.eup %621 }
 0x214   :  { %v414_v7 = vadd.f32 1.0, %v622_v6 }
 0x215   :  { %v624_v8 = vpop.eup %623 }
 0x216   :  { %625 = vrcp.f32 %v414_v7  ;;  %v413_v9 = vadd.f32 1.0, %v624_v8 }
 0x218   :  { %627 = vrcp.f32 %v413_v9 }
 0x223   :  { %v626_v11 = vpop.eup %625 }
 0x224   :  { %v422_v13 = vmul.f32 %v626_v11, %v420_v10 }
 0x225   :  { %v628_v14 = vpop.eup %627 }
 0x226   :  { %v421_v15 = vmul.f32 %v628_v14, %v419_v12  ;;  %424 = vst [vmem:[#allocation13 + $0x8] sm:$0xff] %v422_v13 }
 0x228   :  { %423 = vst [vmem:[#allocation13] sm:$0xff] %v421_v15 }
 0x229   :  { %760 = shalt.err (!%p757_p6)
}
 0x22a   :  { %436 = dma.vmem_to_hbm [thread:$0]  %s431_s15, 256, %s889_s8, [#allocation4], %s781_s10, %s781_s10, %s782_s11  }
 0x22b   :  { %777 = dma.done.wait [#allocation4], 256  }
 0x22c   :  { %778 = vsyncadd [#allocation4], 4294967040 }
 0x22d   :  { %440 = vsyncpa [#allocation3], 1 }
 0x22e   :  { %441 = vsyncpa [#allocation6], 1 }
 0x22f   :  { %442 = vsyncpa [#allocation9], 1 }
 0x230   :  { %443 = vsyncpa [#allocation12], 1 }
 0x231   :  { %444 = vsyncpa [#allocation4], 1 }

</bundles_post_ra>
